<compile_context>
chip_gen: v7x
topology: tpu7x:2x2x1
jax: 0.10.0
libtpu: 0.0.40
codegen_flags: <defaults>
</compile_context>

<pallas_src>
import jax
import jax.numpy as jnp
from jax.experimental import pallas as pl
from jax.experimental.pallas import tpu as pltpu

EMBED_DIM = 32
NUM_ATT = 8


def _numeric_regression_kernel(att_ref, wt_ref, entt_ref, out_ref):
    # att_ref : VMEM (1, B)        int32  -- attribute indices, B on the lane axis
    # wt_ref  : VMEM (D, NUM_ATT)  f32    -- transposed weight table (first D cols of embedding)
    # entt_ref: VMEM (D, B)        f32    -- transposed entity vectors
    # out_ref : VMEM (1, B)        f32    -- lane-dense output row
    D, B = entt_ref.shape
    num_att = wt_ref.shape[1]

    att = att_ref[...]                      # (1, B) int32
    wt = wt_ref[...]                        # (D, num_att) f32, loaded once

    # Unrolled VPU gather: acc[d, b] = emb_table[att[b], d]   (no MXU)
    acc = jnp.zeros((D, B), jnp.float32)
    for a in range(num_att):                # NUM_ATT = 8, static unroll
        sel = (att == a).astype(jnp.float32)          # (1, B)
        acc = acc + sel * wt[:, a:a + 1]              # (D,1) * (1,B) -> (D,B)

    # logits[b] = sum_d ent[b,d] * att_w[b,d]   (sublane reduce, XLU)
    logits = jnp.sum(entt_ref[...] * acc, axis=0, keepdims=True)   # (1, B)
    bias = acc[1:2, :]                      # att_w[:, 1], exactly as in the spec

    out_ref[...] = jax.nn.sigmoid(logits + bias).astype(out_ref.dtype)


def numeric_regression(ent, att, emb_table):
    # ent: (B, D) f32; att: (B,) i32; emb_table: (NUM_ATT, D+1) f32  ->  (B,) f32
    B, D = ent.shape
    num_att, dp1 = emb_table.shape
    assert dp1 == D + 1

    # Layout plumbing (wrapper-side reshape/transpose to get lane-dense kernel I/O).
    att2d = att.reshape(1, B).astype(jnp.int32)   # (1, B)
    ent_t = ent.T                                 # (D, B)
    wt_t = emb_table[:, :D].T                     # (D, NUM_ATT); last column of the
    #                                               embedding is unused by the forward.

    cost = pl.CostEstimate(
        flops=3 * B * num_att * D + 2 * B * D + 2 * B,
        transcendentals=B,
        bytes_accessed=(att2d.size * 4 + wt_t.size * 4 + ent_t.size * 4 + B * 4),
    )

    out = pl.pallas_call(
        _numeric_regression_kernel,
        out_shape=jax.ShapeDtypeStruct((1, B), ent.dtype),
        grid_spec=pltpu.PrefetchScalarGridSpec(
            num_scalar_prefetch=0,
            grid=(1,),
            in_specs=[
                pl.BlockSpec((1, B), lambda i: (0, 0)),          # att indices (lane-dense)
                pl.BlockSpec((D, num_att), lambda i: (0, 0)),    # weight table^T (resident)
                pl.BlockSpec((D, B), lambda i: (0, 0)),          # entity vectors^T
            ],
            out_specs=pl.BlockSpec((1, B), lambda i: (0, 0)),    # lane-dense output row
        ),
        compiler_params=pltpu.CompilerParams(
            dimension_semantics=("arbitrary",),
        ),
        cost_estimate=cost,
    )(att2d, wt_t, ent_t)
    return out.reshape(B)


if __name__ == "__main__":
    B = 8
    key = jax.random.PRNGKey(0)
    k_ent, k_att, k_emb = jax.random.split(key, 3)

    # inputs
    ent = jax.random.normal(k_ent, (B, EMBED_DIM), dtype=jnp.float32)
    att = jax.random.randint(k_att, (B,), 0, NUM_ATT, dtype=jnp.int32)

    # deterministic parameters: nn.Embedding(num_att, embed_dim + 1) weight ~ N(0, 1)
    emb_table = jax.random.normal(k_emb, (NUM_ATT, EMBED_DIM + 1), dtype=jnp.float32)

    out = numeric_regression(ent, att, emb_table)
    out = jax.block_until_ready(out)

    # reference (plain JAX) check
    att_w = emb_table[att]                                            # (B, D+1)
    ref = jax.nn.sigmoid(jnp.sum(ent * att_w[:, :EMBED_DIM], axis=1) + att_w[:, 1])
    assert out.shape == (B,)
    assert jnp.allclose(out, ref, atol=1e-5, rtol=1e-5), "kernel mismatch vs reference"

    print("KERNEL_OK")
</pallas_src>

<mosaic_0001>
module attributes {stable_mosaic.version = 11 : i64} {
  func.func @_numeric_regression_kernel(%arg0: i32, %arg1: memref<1x8xi32, #tpu.memory_space<vmem>>, %arg2: memref<32x8xf32, #tpu.memory_space<vmem>>, %arg3: memref<32x8xf32, #tpu.memory_space<vmem>>, %arg4: memref<1x8xf32, #tpu.memory_space<vmem>>) attributes {dimension_semantics = [#tpu.dimension_semantics<arbitrary>], iteration_bounds = array<i64: 1>, scalar_prefetch = 0 : i64, scratch_operands = 0 : i64, tpu.core_type = #tpu.core_type<tc>, window_params = [{pipeline_mode = #tpu.pipeline_mode<synchronous>, transform_indices = @transform_0, window_bounds = array<i64: 1, 8>}, {pipeline_mode = #tpu.pipeline_mode<synchronous>, transform_indices = @transform_1, window_bounds = array<i64: 32, 8>}, {pipeline_mode = #tpu.pipeline_mode<synchronous>, transform_indices = @transform_2, window_bounds = array<i64: 32, 8>}, {pipeline_mode = #tpu.pipeline_mode<synchronous>, transform_indices = @transform_3, window_bounds = array<i64: 1, 8>}]} {
    %c0 = arith.constant 0 : index
    %c0_0 = arith.constant 0 : index
    %0 = vector.load %arg1[%c0, %c0_0] : memref<1x8xi32, #tpu.memory_space<vmem>>, vector<1x8xi32>
    %c0_1 = arith.constant 0 : index
    %c0_2 = arith.constant 0 : index
    %1 = vector.load %arg2[%c0_1, %c0_2] : memref<32x8xf32, #tpu.memory_space<vmem>>, vector<32x8xf32>
    %cst = arith.constant 0.000000e+00 : f32
    %2 = vector.broadcast %cst : f32 to vector<32x8xf32>
    %c0_i32 = arith.constant 0 : i32
    %3 = vector.broadcast %c0_i32 : i32 to vector<1x8xi32>
    %4 = arith.cmpi eq, %0, %3 : vector<1x8xi32>
    %5 = arith.extui %4 : vector<1x8xi1> to vector<1x8xi32>
    %6 = arith.sitofp %5 : vector<1x8xi32> to vector<1x8xf32>
    %7 = vector.extract_strided_slice %1 {offsets = [0, 0], sizes = [32, 1], strides = [1, 1]} : vector<32x8xf32> to vector<32x1xf32>
    %8 = vector.broadcast %6 : vector<1x8xf32> to vector<32x8xf32>
    %9 = vector.broadcast %7 : vector<32x1xf32> to vector<32x8xf32>
    %10 = arith.mulf %8, %9 : vector<32x8xf32>
    %11 = arith.addf %2, %10 : vector<32x8xf32>
    %c1_i32 = arith.constant 1 : i32
    %12 = vector.broadcast %c1_i32 : i32 to vector<1x8xi32>
    %13 = arith.cmpi eq, %0, %12 : vector<1x8xi32>
    %14 = arith.extui %13 : vector<1x8xi1> to vector<1x8xi32>
    %15 = arith.sitofp %14 : vector<1x8xi32> to vector<1x8xf32>
    %16 = vector.extract_strided_slice %1 {offsets = [0, 1], sizes = [32, 1], strides = [1, 1]} : vector<32x8xf32> to vector<32x1xf32>
    %17 = vector.broadcast %15 : vector<1x8xf32> to vector<32x8xf32>
    %18 = vector.broadcast %16 : vector<32x1xf32> to vector<32x8xf32>
    %19 = arith.mulf %17, %18 : vector<32x8xf32>
    %20 = arith.addf %11, %19 : vector<32x8xf32>
    %c2_i32 = arith.constant 2 : i32
    %21 = vector.broadcast %c2_i32 : i32 to vector<1x8xi32>
    %22 = arith.cmpi eq, %0, %21 : vector<1x8xi32>
    %23 = arith.extui %22 : vector<1x8xi1> to vector<1x8xi32>
    %24 = arith.sitofp %23 : vector<1x8xi32> to vector<1x8xf32>
    %25 = vector.extract_strided_slice %1 {offsets = [0, 2], sizes = [32, 1], strides = [1, 1]} : vector<32x8xf32> to vector<32x1xf32>
    %26 = vector.broadcast %24 : vector<1x8xf32> to vector<32x8xf32>
    %27 = vector.broadcast %25 : vector<32x1xf32> to vector<32x8xf32>
    %28 = arith.mulf %26, %27 : vector<32x8xf32>
    %29 = arith.addf %20, %28 : vector<32x8xf32>
    %c3_i32 = arith.constant 3 : i32
    %30 = vector.broadcast %c3_i32 : i32 to vector<1x8xi32>
    %31 = arith.cmpi eq, %0, %30 : vector<1x8xi32>
    %32 = arith.extui %31 : vector<1x8xi1> to vector<1x8xi32>
    %33 = arith.sitofp %32 : vector<1x8xi32> to vector<1x8xf32>
    %34 = vector.extract_strided_slice %1 {offsets = [0, 3], sizes = [32, 1], strides = [1, 1]} : vector<32x8xf32> to vector<32x1xf32>
    %35 = vector.broadcast %33 : vector<1x8xf32> to vector<32x8xf32>
    %36 = vector.broadcast %34 : vector<32x1xf32> to vector<32x8xf32>
    %37 = arith.mulf %35, %36 : vector<32x8xf32>
    %38 = arith.addf %29, %37 : vector<32x8xf32>
    %c4_i32 = arith.constant 4 : i32
    %39 = vector.broadcast %c4_i32 : i32 to vector<1x8xi32>
    %40 = arith.cmpi eq, %0, %39 : vector<1x8xi32>
    %41 = arith.extui %40 : vector<1x8xi1> to vector<1x8xi32>
    %42 = arith.sitofp %41 : vector<1x8xi32> to vector<1x8xf32>
    %43 = vector.extract_strided_slice %1 {offsets = [0, 4], sizes = [32, 1], strides = [1, 1]} : vector<32x8xf32> to vector<32x1xf32>
    %44 = vector.broadcast %42 : vector<1x8xf32> to vector<32x8xf32>
    %45 = vector.broadcast %43 : vector<32x1xf32> to vector<32x8xf32>
    %46 = arith.mulf %44, %45 : vector<32x8xf32>
    %47 = arith.addf %38, %46 : vector<32x8xf32>
    %c5_i32 = arith.constant 5 : i32
    %48 = vector.broadcast %c5_i32 : i32 to vector<1x8xi32>
    %49 = arith.cmpi eq, %0, %48 : vector<1x8xi32>
    %50 = arith.extui %49 : vector<1x8xi1> to vector<1x8xi32>
    %51 = arith.sitofp %50 : vector<1x8xi32> to vector<1x8xf32>
    %52 = vector.extract_strided_slice %1 {offsets = [0, 5], sizes = [32, 1], strides = [1, 1]} : vector<32x8xf32> to vector<32x1xf32>
    %53 = vector.broadcast %51 : vector<1x8xf32> to vector<32x8xf32>
    %54 = vector.broadcast %52 : vector<32x1xf32> to vector<32x8xf32>
    %55 = arith.mulf %53, %54 : vector<32x8xf32>
    %56 = arith.addf %47, %55 : vector<32x8xf32>
    %c6_i32 = arith.constant 6 : i32
    %57 = vector.broadcast %c6_i32 : i32 to vector<1x8xi32>
    %58 = arith.cmpi eq, %0, %57 : vector<1x8xi32>
    %59 = arith.extui %58 : vector<1x8xi1> to vector<1x8xi32>
    %60 = arith.sitofp %59 : vector<1x8xi32> to vector<1x8xf32>
    %61 = vector.extract_strided_slice %1 {offsets = [0, 6], sizes = [32, 1], strides = [1, 1]} : vector<32x8xf32> to vector<32x1xf32>
    %62 = vector.broadcast %60 : vector<1x8xf32> to vector<32x8xf32>
    %63 = vector.broadcast %61 : vector<32x1xf32> to vector<32x8xf32>
    %64 = arith.mulf %62, %63 : vector<32x8xf32>
    %65 = arith.addf %56, %64 : vector<32x8xf32>
    %c7_i32 = arith.constant 7 : i32
    %66 = vector.broadcast %c7_i32 : i32 to vector<1x8xi32>
    %67 = arith.cmpi eq, %0, %66 : vector<1x8xi32>
    %68 = arith.extui %67 : vector<1x8xi1> to vector<1x8xi32>
    %69 = arith.sitofp %68 : vector<1x8xi32> to vector<1x8xf32>
    %70 = vector.extract_strided_slice %1 {offsets = [0, 7], sizes = [32, 1], strides = [1, 1]} : vector<32x8xf32> to vector<32x1xf32>
    %71 = vector.broadcast %69 : vector<1x8xf32> to vector<32x8xf32>
    %72 = vector.broadcast %70 : vector<32x1xf32> to vector<32x8xf32>
    %73 = arith.mulf %71, %72 : vector<32x8xf32>
    %74 = arith.addf %65, %73 : vector<32x8xf32>
    %c0_3 = arith.constant 0 : index
    %c0_4 = arith.constant 0 : index
    %75 = vector.load %arg3[%c0_3, %c0_4] : memref<32x8xf32, #tpu.memory_space<vmem>>, vector<32x8xf32>
    %76 = arith.mulf %75, %74 : vector<32x8xf32>
    %cst_5 = arith.constant dense<0.000000e+00> : vector<8xf32>
    %77 = vector.multi_reduction <add>, %76, %cst_5 [0] : vector<32x8xf32> to vector<8xf32>
    %78 = vector.shape_cast %77 : vector<8xf32> to vector<1x8xf32>
    %79 = vector.extract_strided_slice %74 {offsets = [1, 0], sizes = [1, 8], strides = [1, 1]} : vector<32x8xf32> to vector<1x8xf32>
    %80 = arith.addf %78, %79 : vector<1x8xf32>
    %81 = arith.negf %80 : vector<1x8xf32>
    %82 = math.exp %81 : vector<1x8xf32>
    %cst_6 = arith.constant 1.000000e+00 : f32
    %83 = vector.broadcast %cst_6 : f32 to vector<1x8xf32>
    %84 = arith.addf %83, %82 : vector<1x8xf32>
    %85 = arith.divf %83, %84 : vector<1x8xf32>
    %c0_7 = arith.constant 0 : index
    %c0_8 = arith.constant 0 : index
    %86 = vector.load %arg4[%c0_7, %c0_8] : memref<1x8xf32, #tpu.memory_space<vmem>>, vector<1x8xf32>
    tpu.vector_store %arg4[%c0_7, %c0_8], %85 {strides = array<i32>} : memref<1x8xf32, #tpu.memory_space<vmem>>, vector<1x8xf32>,
    return
  }
  func.func @transform_0(%arg0: i32) -> (i32, i32) {
    %c0_i32 = arith.constant 0 : i32
    %c0_i32_0 = arith.constant 0 : i32
    %c0_i32_1 = arith.constant 0 : i32
    return %c0_i32, %c0_i32_0 : i32, i32
  }
  func.func @transform_1(%arg0: i32) -> (i32, i32) {
    %c0_i32 = arith.constant 0 : i32
    %c0_i32_0 = arith.constant 0 : i32
    %c0_i32_1 = arith.constant 0 : i32
    return %c0_i32, %c0_i32_0 : i32, i32
  }
  func.func @transform_2(%arg0: i32) -> (i32, i32) {
    %c0_i32 = arith.constant 0 : i32
    %c0_i32_0 = arith.constant 0 : i32
    %c0_i32_1 = arith.constant 0 : i32
    return %c0_i32, %c0_i32_0 : i32, i32
  }
  func.func @transform_3(%arg0: i32) -> (i32, i32) {
    %c0_i32 = arith.constant 0 : i32
    %c0_i32_0 = arith.constant 0 : i32
    %c0_i32_1 = arith.constant 0 : i32
    return %c0_i32, %c0_i32_0 : i32, i32
  }
}

</mosaic_0001>

<bundles_post_ra>
// kernel: tpu_custom_call.1
= control target key start
LH: loop header
LB: loop body
LE: loop exit
PB: predicated region body
PF: predicated region fallthrough
CT: control target
= control target key end

     0   :  { %v405_v1 = vmov 1   ;;  %v406_v2 = vmov 0   ;;  %s502_s0 = inlined_call_operand.vmem [shape: s32[1,8], index: 0, kind: input, shape index: {}]   ;;  %s503_s1 = inlined_call_operand.vmem [shape: f32[32,8], index: 1, kind: input, shape index: {}]   ;;  %s504_s2 = inlined_call_operand.vmem [shape: f32[32,8], index: 2, kind: input, shape index: {}]   ;;  %s505_s3 = inlined_call_operand.hbm [shape: f32[1,8], index: 3, kind: output, shape index: {}]  }
   0x1   :  { %v438_v0 = vld [vmem:[%s503_s1] sm:$0xff]  ;;  %353 = vset.pattern.permute.xlu1 %v405_v1  ;;  %352 = vset.pattern.permute.xlu0 %v406_v2  ;;  %v17_v3 = vld [vmem:[%s503_s1 + $0x8] sm:$0xff] }
   0x2   :  { %67 = vperm.xlu1 %353, %v438_v0   ;;  %31 = vperm.xlu0 %352, %v438_v0  }
   0x3   :  { %8 = vsyncpa [#allocation3], 0  ;;  %v18_v4 = vld [vmem:[%s503_s1 + $0x10] sm:$0xff]  ;;  %v407_v5 = vmov 2   ;;  %v19_v6 = vld [vmem:[%s503_s1 + $0x18] sm:$0xff]  ;;  %v408_v7 = vmov 3   ;;  %v24_v27 = vlaneseq }
   0x4   :  { %v409_v8 = vmov 4   ;;  %v410_v9 = vmov 5   ;;  %v411_v10 = vmov 6   ;;  %v412_v11 = vmov 7   ;;  %v15_v29 = vld [vmem:[%s502_s0] sm:$0x1] }
   0x5   :  { %v25_v31 = vshrl.u32 %v24_v27, 7  ;;  %vm57_vm0 = vcmp.eq.s32.totalorder %v15_v29, 1  ;;  %vm20_vm1 = vcmp.eq.s32.totalorder %v15_v29, 0  ;;  %vm90_vm2 = vcmp.eq.s32.totalorder %v15_v29, 2 }
   0x6   :  { %71 = vperm.xlu1 %353, %v17_v3   ;;  %36 = vperm.xlu0 %352, %v17_v3   ;;  %v413_v35 = vmov 0.0   ;;  %vm123_vm3 = vcmp.eq.s32.totalorder %v15_v29, 3  ;;  %vm156_vm4 = vcmp.eq.s32.totalorder %v15_v29, 4  ;;  %vm189_vm5 = vcmp.eq.s32.totalorder %v15_v29, 5 }
   0x7   :  { %v26_v34 = vsub.s32 0, %v25_v31  ;;  %v334_v36 = vsel %vm57_vm0, 1.0, %v413_v35  ;;  %v333_v37 = vsel %vm20_vm1, 1.0, %v413_v35  ;;  %v335_v38 = vsel %vm90_vm2, 1.0, %v413_v35 }
   0x8   :  { %v336_v44 = vsel %vm123_vm3, 1.0, %v413_v35  ;;  %v337_v47 = vsel %vm156_vm4, 1.0, %v413_v35  ;;  %vm222_vm6 = vcmp.eq.s32.totalorder %v15_v29, 6  ;;  %v338_v58 = vsel %vm189_vm5, 1.0, %v413_v35 }
   0x9   :  { %v64_v41 = vrot.slane %v334_v36, %v26_v34  ;;  %v27_v42 = vrot.slane %v333_v37, %v26_v34  ;;  %v97_v43 = vrot.slane %v335_v38, %v26_v34  ;;  %v130_v53 = vrot.slane %v336_v44, %v26_v34 }
   0xa   :  { %75 = vperm.xlu1 %353, %v18_v4   ;;  %41 = vperm.xlu0 %352, %v18_v4   ;;  %v163_v54 = vrot.slane %v337_v47, %v26_v34  ;;  %vm255_vm7 = vcmp.eq.s32.totalorder %v15_v29, 7  ;;  %vm296_vm8 = vcmask 64512   ;;  %vm317_vm9 = vcmask 58369  }
   0xe   :  { %355 = vset.pattern.permute.xlu1 %v407_v5  ;;  %354 = vset.pattern.permute.xlu0 %v407_v5 }
   0xf   :  { %104 = vperm.xlu1 %355, %v17_v3   ;;  %100 = vperm.xlu0 %354, %v438_v0  }
  0x13   :  { %356 = vset.pattern.permute.xlu1 %v406_v2  ;;  %357 = vset.pattern.permute.xlu0 %v405_v1 }
  0x14   :  { %46 = vperm.xlu1 %356, %v19_v6   ;;  %79 = vperm.xlu0 %357, %v19_v6  }
  0x18   :  { %358 = vset.pattern.permute.xlu1 %v407_v5  ;;  %360 = vset.pattern.permute.xlu0 %v408_v7 }
  0x19   :  { %108 = vperm.xlu1 %358, %v18_v4   ;;  %137 = vperm.xlu0 %360, %v17_v3  }
  0x1d   :  { %359 = vset.pattern.permute.xlu1 %v408_v7  ;;  %363 = vset.pattern.permute.xlu0 %v409_v8 }
  0x1e   :  { %133 = vperm.xlu1 %359, %v438_v0   ;;  %166 = vperm.xlu0 %363, %v438_v0  }
  0x22   :  { %361 = vset.pattern.permute.xlu1 %v407_v5  ;;  %174 = vperm.xlu0 %363, %v18_v4  }
  0x23   :  { %112 = vperm.xlu1 %361, %v19_v6  }
  0x26   :  { %367 = vset.pattern.permute.xlu0 %v410_v9 }
  0x27   :  { %362 = vset.pattern.permute.xlu1 %v408_v7  ;;  %203 = vperm.xlu0 %367, %v17_v3  }
  0x28   :  { %141 = vperm.xlu1 %362, %v18_v4  }
  0x2b   :  { %370 = vset.pattern.permute.xlu0 %v411_v10 }
  0x2c   :  { %364 = vset.pattern.permute.xlu1 %v409_v8  ;;  %232 = vperm.xlu0 %370, %v438_v0  }
  0x2d   :  { %170 = vperm.xlu1 %364, %v17_v3  }
  0x30   :  { %240 = vperm.xlu0 %370, %v18_v4  }
  0x31   :  { %365 = vset.pattern.permute.xlu1 %v408_v7 }
  0x32   :  { %145 = vperm.xlu1 %365, %v19_v6  }
  0x34   :  { %374 = vset.pattern.permute.xlu0 %v412_v11 }
  0x35   :  { %269 = vperm.xlu0 %374, %v17_v3  }
  0x36   :  { %366 = vset.pattern.permute.xlu1 %v410_v9 }
  0x37   :  { %199 = vperm.xlu1 %366, %v438_v0  }
  0x39   :  { %277 = vperm.xlu0 %374, %v19_v6  }
  0x3b   :  { %368 = vset.pattern.permute.xlu1 %v409_v8 }
  0x3c   :  { %178 = vperm.xlu1 %368, %v19_v6  }
  0x40   :  { %369 = vset.pattern.permute.xlu1 %v410_v9 }
  0x41   :  { %207 = vperm.xlu1 %369, %v18_v4  }
  0x45   :  { %371 = vset.pattern.permute.xlu1 %v411_v10 }
  0x46   :  { %236 = vperm.xlu1 %371, %v17_v3   ;;  %v196_v3 = vrot.slane %v338_v58, %v26_v34 }
  0x4a   :  { %372 = vset.pattern.permute.xlu1 %v410_v9 }
  0x4b   :  { %211 = vperm.xlu1 %372, %v19_v6  }
  0x4f   :  { %373 = vset.pattern.permute.xlu1 %v412_v11 }
  0x50   :  { %265 = vperm.xlu1 %373, %v438_v0   ;;  %v339_v0 = vsel %vm222_vm6, 1.0, %v413_v35 }
  0x54   :  { %375 = vset.pattern.permute.xlu1 %v411_v10  ;;  %v229_v10 = vrot.slane %v339_v0, %v26_v34  ;;  %v291_v0 = vld [vmem:[%s504_s2 + $0x18] sm:$0xff] }
  0x55   :  { %244 = vperm.xlu1 %375, %v19_v6  }
  0x59   :  { %376 = vset.pattern.permute.xlu1 %v412_v11 }
  0x5a   :  { %273 = vperm.xlu1 %376, %v18_v4  }
  0x81   :  { %v68_v12 = vpop.permute.xlu1 %67  ;;  %v32_v17 = vpop.permute.xlu0 %31 }
  0x82   :  { %v82_v45 = vmul.f32 %v68_v12, %v64_v41  ;;  %v49_v46 = vmul.f32 %v32_v17, %v27_v42  ;;  %v340_v17 = vsel %vm255_vm7, 1.0, %v413_v35 }
  0x84   :  { %v86_v55 = vadd.f32 %v82_v45, %v49_v46 }
  0x85   :  { %v72_v13 = vpop.permute.xlu1 %71  ;;  %v37_v19 = vpop.permute.xlu0 %36 }
  0x86   :  { %v83_v50 = vmul.f32 %v72_v13, %v64_v41  ;;  %v50_v51 = vmul.f32 %v37_v19, %v27_v42 }
  0x88   :  { %v87_v61 = vadd.f32 %v83_v50, %v50_v51 }
  0x89   :  { %v76_v14 = vpop.permute.xlu1 %75  ;;  %v42_v21 = vpop.permute.xlu0 %41 }
  0x8a   :  { %v84_v1 = vmul.f32 %v76_v14, %v64_v41  ;;  %v51_v2 = vmul.f32 %v42_v21, %v27_v42 }
  0x8e   :  { %v105_v15 = vpop.permute.xlu1 %104  ;;  %v101_v23 = vpop.permute.xlu0 %100 }
  0x8f   :  { %v115_v52 = vmul.f32 %v101_v23, %v97_v43  ;;  %v116_v56 = vmul.f32 %v105_v15, %v97_v43 }
  0x91   :  { %v119_v62 = vadd.f32 %v115_v52, %v86_v55  ;;  %v120_v4 = vadd.f32 %v116_v56, %v87_v61 }
  0x93   :  { %v457_v16 = vpop.permute.xlu1 %46  ;;  %v80_v26 = vpop.permute.xlu0 %79 }
  0x94   :  { %v52_v8 = vmul.f32 %v457_v16, %v27_v42  ;;  %v85_v9 = vmul.f32 %v80_v26, %v64_v41  ;;  %v262_v26 = vrot.slane %v340_v17, %v26_v34 }
  0x98   :  { %v459_v18 = vpop.permute.xlu1 %108  ;;  %v138_v30 = vpop.permute.xlu0 %137 }
  0x99   :  { %v149_v63 = vmul.f32 %v138_v30, %v130_v53  ;;  %v117_v12 = vmul.f32 %v459_v18, %v97_v43 }
  0x9b   :  { %v153_v13 = vadd.f32 %v149_v63, %v120_v4 }
  0x9d   :  { %v134_v20 = vpop.permute.xlu1 %133  ;;  %v167_v33 = vpop.permute.xlu0 %166 }
  0x9e   :  { %v148_v57 = vmul.f32 %v134_v20, %v130_v53  ;;  %v181_v6 = vmul.f32 %v167_v33, %v163_v54  ;;  %v88_v20 = vadd.f32 %v84_v1, %v51_v2  ;;  %v290_v1 = vld [vmem:[%s504_s2 + $0x10] sm:$0xff] }
  0xa0   :  { %v152_v5 = vadd.f32 %v148_v57, %v119_v62  ;;  %v121_v30 = vadd.f32 %v117_v12, %v88_v20 }
  0xa1   :  { %v470_v39 = vpop.permute.xlu0 %174 }
  0xa2   :  { %v461_v22 = vpop.permute.xlu1 %112  ;;  %v185_v21 = vadd.f32 %v181_v6, %v152_v5 }
  0xa3   :  { %v118_v14 = vmul.f32 %v461_v22, %v97_v43  ;;  %v183_v22 = vmul.f32 %v470_v39, %v163_v54 }
  0xa6   :  { %v204_v49 = vpop.permute.xlu0 %203 }
  0xa7   :  { %v463_v24 = vpop.permute.xlu1 %141  ;;  %v215_v29 = vmul.f32 %v204_v49, %v196_v3 }
  0xa8   :  { %v150_v23 = vmul.f32 %v463_v24, %v130_v53 }
  0xaa   :  { %v154_v38 = vadd.f32 %v150_v23, %v121_v30 }
  0xab   :  { %v233_v59 = vpop.permute.xlu0 %232 }
  0xac   :  { %v171_v25 = vpop.permute.xlu1 %170  ;;  %v247_v33 = vmul.f32 %v233_v59, %v229_v10  ;;  %v187_v49 = vadd.f32 %v183_v22, %v154_v38 }
  0xad   :  { %v182_v7 = vmul.f32 %v171_v25, %v163_v54  ;;  %v89_v25 = vadd.f32 %v85_v9, %v52_v8 }
  0xaf   :  { %v241_v11 = vpop.permute.xlu0 %240  ;;  %v186_v27 = vadd.f32 %v182_v7, %v153_v13  ;;  %v122_v36 = vadd.f32 %v118_v14, %v89_v25 }
  0xb1   :  { %v465_v28 = vpop.permute.xlu1 %145  ;;  %v219_v41 = vadd.f32 %v215_v29, %v186_v27 }
  0xb2   :  { %v151_v16 = vmul.f32 %v465_v28, %v130_v53 }
  0xb4   :  { %v270_v35 = vpop.permute.xlu0 %269  ;;  %v155_v24 = vadd.f32 %v151_v16, %v122_v36 }
  0xb5   :  { %v281_v28 = vmul.f32 %v270_v35, %v262_v26 }
  0xb6   :  { %v200_v32 = vpop.permute.xlu1 %199 }
  0xb7   :  { %v214_v15 = vmul.f32 %v200_v32, %v196_v3 }
  0xb8   :  { %v278_v47 = vpop.permute.xlu0 %277 }
  0xb9   :  { %v218_v31 = vadd.f32 %v214_v15, %v185_v21  ;;  %v283_v56 = vmul.f32 %v278_v47, %v262_v26 }
  0xbb   :  { %v179_v40 = vpop.permute.xlu1 %178  ;;  %v251_v44 = vadd.f32 %v247_v33, %v218_v31 }
  0xbc   :  { %v184_v32 = vmul.f32 %v179_v40, %v163_v54  ;;  %v288_v40 = vld [vmem:[%s504_s2] sm:$0xff]  ;;  %v249_v54 = vmul.f32 %v241_v11, %v229_v10 }
  0xbe   :  { %v188_v34 = vadd.f32 %v184_v32, %v155_v24 }
  0xc0   :  { %v208_v48 = vpop.permute.xlu1 %207 }
  0xc1   :  { %v216_v45 = vmul.f32 %v208_v48, %v196_v3  ;;  %v289_v48 = vld [vmem:[%s504_s2 + $0x8] sm:$0xff]  ;;  %s414_s2 = smov [#allocation2]  }
  0xc2   :  { %s325_s28 = sshll.u32 %s414_s2, 4  ;;  %s326_s28 = int_to_ptr.vmem [resolvable:$true] %s325_s28 }
  0xc3   :  { %v220_v39 = vadd.f32 %v216_v45, %v187_v49  ;;  %s381_s29 = scalar_lea.vmem %s326_s28, 16  ;;  %s385_s30 = scalar_lea.vmem %s326_s28, 32 }
  0xc4   :  { %p382_p0 = scmp.ne.s32.totalorder %s326_s28, %s381_s29  ;;  %p386_p1 = scmp.lt.s32.totalorder %s326_s28, %s326_s28 }
  0xc5   :  { %v237_v60 = vpop.permute.xlu1 %236  ;;  %p387_p2 = scmp.lt.s32.totalorder %s385_s30, %s381_s29 }
  0xc6   :  { %v248_v18 = vmul.f32 %v237_v60, %v229_v10  ;;  %v253_v60 = vadd.f32 %v249_v54, %v220_v39 }
  0xc7   :  { %p388_p3 = por %p387_p2, %p386_p1 }
  0xc8   :  { %v252_v46 = vadd.f32 %v248_v18, %v219_v41 }
  0xc9   :  { %p389_p4 = pnand %p388_p3, %p382_p0 }
  0xca   :  { %v212_v19 = vpop.permute.xlu1 %211  ;;  %v285_v55 = vadd.f32 %v281_v28, %v252_v46 }
  0xcb   :  { %v217_v43 = vmul.f32 %v212_v19, %v196_v3 }
  0xcc   :  { %v293_v61 = vmul.f32 %v289_v48, %v285_v55 }
  0xcd   :  { %v221_v52 = vadd.f32 %v217_v43, %v188_v34 }
  0xce   :  { %v298_v4 = vsel %vm296_vm8, %v293_v61, 0.0 }
  0xcf   :  { %v266_v37 = vpop.permute.xlu1 %265 }
  0xd0   :  { %v280_v42 = vmul.f32 %v266_v37, %v262_v26 }
  0xd2   :  { %v284_v50 = vadd.f32 %v280_v42, %v251_v44 }
  0xd4   :  { %v245_v51 = vpop.permute.xlu1 %244  ;;  %v292_v58 = vmul.f32 %v288_v40, %v284_v50 }
  0xd5   :  { %v250_v53 = vmul.f32 %v245_v51, %v229_v10 }
  0xd6   :  { %v297_v2 = vsel %vm296_vm8, %v292_v58, 0.0 }
  0xd7   :  { %v254_v57 = vadd.f32 %v250_v53, %v221_v52  ;;  %v299_v7 = vadd.f32 %v298_v4, %v297_v2 }
  0xd9   :  { %v274_v59 = vpop.permute.xlu1 %273  ;;  %v287_v62 = vadd.f32 %v283_v56, %v254_v57 }
  0xda   :  { %v282_v63 = vmul.f32 %v274_v59, %v262_v26 }
  0xdb   :  { %v295_v5 = vmul.f32 %v291_v0, %v287_v62 }
  0xdc   :  { %v286_v3 = vadd.f32 %v282_v63, %v253_v60 }
  0xdd   :  { %v302_v10 = vsel %vm296_vm8, %v295_v5, 0.0 }
  0xde   :  { %v294_v6 = vmul.f32 %v290_v1, %v286_v3 }
  0xe0   :  { %v300_v8 = vsel %vm296_vm8, %v294_v6, 0.0 }
  0xe1   :  { %v301_v9 = vadd.f32 %v300_v8, %v299_v7 }
  0xe3   :  { %v303_v11 = vadd.f32 %v302_v10, %v301_v9 }
  0xe5   :  { %v304_v12 = vrot.slane %v303_v11, 4 }
  0xe7   :  { %v305_v13 = vadd.f32 %v304_v12, %v303_v11 }
  0xe9   :  { %v306_v15 = vrot.slane %v305_v13, 2 }
  0xeb   :  { %v307_v17 = vadd.f32 %v306_v15, %v305_v13 }
  0xed   :  { %v308_v19 = vrot.slane %v307_v17, 1 }
  0xef   :  { %v309_v20 = vadd.f32 %v308_v19, %v307_v17 }
  0xf1   :  { %v310_v14 = vadd.f32 %v309_v20, %v284_v50 }
  0xf3   :  { %v341_v21 = vmul.f32 -1.442695, %v310_v14 }
  0xf5   :  { %377 = vpow2.f32 %v341_v21 }
  0xff   :  { %v378_v23 = vpop.eup %377 }
 0x100   :  { %v314_v27 = vadd.f32 1.0, %v378_v23 }
 0x102   :  { %379 = vrcp.f32 %v314_v27 }
 0x10c   :  { %v380_v29 = vpop.eup %379 }
 0x10d   :  { %318 = vst.msk [vmem:[#allocation2 - $0x1] sm:$0x2] %vm317_vm9, %v380_v29 }
 0x10e   :  { %392 = shalt.err (!%p389_p4)
}
 0x10f   :  { %s393_s6 = scalar_lea.hbm %s505_s3, 16 }
 0x110   :  { %p394_p5 = scmp.ne.s32.totalorder %s505_s3, %s393_s6  ;;  %p397_p6 = scmp.lt.u32.totalorder %s393_s6, %s505_s3 }
 0x112   :  { %p399_p7 = pnand %p397_p6, %p394_p5 }
 0x114   :  { %402 = shalt.err (!%p399_p7)
}
 0x115   :  { %328 = dma.vmem_to_hbm [thread:$0]  %s326_s28, 16, %s505_s3, [#allocation3]  }
 0x116   :  { %403 = dma.done.wait [#allocation3], 16  }
 0x117   :  { %404 = vsyncadd [#allocation3], 4294967280 }
 0x118   :  { %332 = vsyncpa [#allocation3], 1 }

</bundles_post_ra>
